<compile_context>
chip_gen: v5e
topology: v5e:2x2
jax: 0.10.0
libtpu: 0.0.40
codegen_flags: <defaults>
</compile_context>

<pallas_src>
import math
import jax
import jax.numpy as jnp
from jax.experimental import pallas as pl
from jax.experimental.pallas import tpu as pltpu

LN_EPS = 1e-5
BN_EPS = 1e-5
_INV_SQRT2 = 1.0 / math.sqrt(2.0)


def _round_up(a, b):
    return -(-a // b) * b


def _round_down(a, b):
    return (a // b) * b


def _make_embed_kernel(n_layers, in_dims, mxu_dtype, gelu_approx):
    """Refs: (x, bn_scale, bn_shift, [ln_g, ln_b, w, b] * n_layers, out)."""

    def kernel(x_ref, bn_s_ref, bn_b_ref, *refs):
        o_ref = refs[-1]
        layer_refs = refs[:-1]

        # (1, C, T) -> (C, T) -> (T, C): in-tile relayout on the XLU.
        h = jnp.transpose(x_ref[0]).astype(jnp.float32)

        # Folded eval-mode BatchNorm1d: per-input-feature scale/shift, applied
        # once before the first LayerNorm only.
        h = h * bn_s_ref[...] + bn_b_ref[...]

        for li in range(n_layers):
            ln_g, ln_b, w, b = layer_refs[4 * li:4 * li + 4]
            inv_c = 1.0 / float(in_dims[li])

            # One-pass LayerNorm statistics (sum / sum of squares), f32.
            s1 = jnp.sum(h, axis=-1, keepdims=True)
            s2 = jnp.sum(h * h, axis=-1, keepdims=True)
            mean = s1 * inv_c
            var = jnp.maximum(s2 * inv_c - mean * mean, 0.0)
            hn = (h - mean) * jax.lax.rsqrt(var + LN_EPS)
            hn = hn * ln_g[...] + ln_b[...]

            # Linear on the MXU; weights were pre-cast in the wrapper, only
            # the activation is cast here (f32 accumulation).
            y = jnp.dot(hn.astype(mxu_dtype), w[...],
                        preferred_element_type=jnp.float32) + b[...]

            if gelu_approx:
                # tanh-form GELU routes through the EUP slot (use if a profile
                # shows the VPU saturating); erf form is torch.nn.GELU default.
                h = jax.nn.gelu(y, approximate=True)
            else:
                h = 0.5 * y * (1.0 + jax.lax.erf(y * _INV_SQRT2))

        o_ref[...] = h.astype(o_ref.dtype)

    return kernel


def embed_forward(x, params, *, tile_l=4096, mxu_dtype=jnp.bfloat16,
                  out_dtype=jnp.float32, gelu_approx=False):
    """x: (batch N, input_dim C, seq_len L).  Returns (L, N, dims[-1])."""
    N, C, L = x.shape
    x = x.astype(jnp.float32)
    layers = params["layers"]
    n_layers = len(layers)
    feat_dims = [C] + [int(l["w"].shape[1]) for l in layers]
    d_out = feat_dims[-1]

    bn = params["bn"]
    bn_scale = (bn["gamma"] *
                jax.lax.rsqrt(bn["running_var"] + BN_EPS)).astype(jnp.float32)
    bn_shift = (bn["beta"] - bn["running_mean"] * bn_scale).astype(jnp.float32)

    # ---- choose the L tile (rows per grid step) ---------------------------
    max_dim = max(feat_dims)
    # crude per-row VMEM bytes: double-buffered in/out blocks + ~6 live f32
    # intermediates of the widest layer; keep peak well under the 32 MiB ask.
    per_row_bytes = 4 * (2 * C + 2 * d_out + 6 * max_dim)
    vmem_budget = 24 * 1024 * 1024
    cap = max(128, _round_down(vmem_budget // per_row_bytes, 128))
    tl = max(128, _round_down(min(int(tile_l), cap), 128))
    if L <= tl:
        tile_L = L                       # full extent (any L allowed)
        if N == 1 and L > 256:           # keep the 'parallel' grid >= 2 blocks
            tile_L = _round_up(pl.cdiv(L, 2), 128)
    else:
        tile_L = tl                      # multiple of 128; edge block masked
    grid = (pl.cdiv(L, tile_L), N)

    # ---- operands & specs --------------------------------------------------
    in_specs = [
        # native-layout input tile: batch n, all C features, tile_L positions
        pl.BlockSpec((1, C, tile_L), lambda l, n: (n, 0, l)),
        pl.BlockSpec((1, C), lambda l, n: (0, 0)),   # folded BN scale
        pl.BlockSpec((1, C), lambda l, n: (0, 0)),   # folded BN shift
    ]
    operands = [x, bn_scale.reshape(1, C), bn_shift.reshape(1, C)]

    c = C
    for layer in layers:
        d = int(layer["w"].shape[1])
        # NOTE: these tiny per-layer params could be packed into one array to
        # trim prologue DMAs; they are resident (constant index_map) so the
        # steady-state cost is nil.
        in_specs += [
            pl.BlockSpec((1, c), lambda l, n: (0, 0)),   # LN gamma
            pl.BlockSpec((1, c), lambda l, n: (0, 0)),   # LN beta
            pl.BlockSpec((c, d), lambda l, n: (0, 0)),   # weight (in, out)
            pl.BlockSpec((1, d), lambda l, n: (0, 0)),   # bias
        ]
        operands += [
            layer["ln_g"].reshape(1, c).astype(jnp.float32),
            layer["ln_b"].reshape(1, c).astype(jnp.float32),
            layer["w"].astype(mxu_dtype),                # pre-cast once
            layer["b"].reshape(1, d).astype(jnp.float32),
        ]
        c = d

    # Output laid out (L, N*d_out): row block = L tile, column block = batch.
    # The reshape to (L, N, d_out) below is pure metadata (no HBM pass), and
    # the store is lane-dense whenever d_out is a multiple of 128.
    out = pl.pallas_call(
        _make_embed_kernel(n_layers, tuple(feat_dims[:-1]), mxu_dtype,
                           gelu_approx),
        out_shape=jax.ShapeDtypeStruct((L, N * d_out), out_dtype),
        grid=grid,
        in_specs=in_specs,
        out_specs=pl.BlockSpec((tile_L, d_out), lambda l, n: (l, n)),
        compiler_params=pltpu.CompilerParams(
            dimension_semantics=("parallel", "parallel"),
            vmem_limit_bytes=32 * 1024 * 1024,
        ),
    )(*operands)

    return out.reshape(L, N, d_out)


def embed_reference(x, params):
    """Pure-JAX reference of the same forward pass (high-precision matmuls)."""
    bn = params["bn"]
    xn = (x - bn["running_mean"][None, :, None]) / jnp.sqrt(
        bn["running_var"][None, :, None] + BN_EPS)
    xn = xn * bn["gamma"][None, :, None] + bn["beta"][None, :, None]
    h = jnp.transpose(xn, (2, 0, 1))
    for layer in params["layers"]:
        mean = jnp.mean(h, axis=-1, keepdims=True)
        var = jnp.mean(jnp.square(h - mean), axis=-1, keepdims=True)
        h = (h - mean) / jnp.sqrt(var + LN_EPS)
        h = h * layer["ln_g"] + layer["ln_b"]
        h = jnp.dot(h, layer["w"],
                    precision=jax.lax.Precision.HIGHEST) + layer["b"]
        h = 0.5 * h * (1.0 + jax.lax.erf(h / math.sqrt(2.0)))
    return h


def init_params(key, input_dim, dims):
    n_layers = len(dims)
    keys = jax.random.split(key, 4 + 4 * n_layers)
    params = {
        "bn": {
            "gamma": jax.random.normal(keys[0], (input_dim,), jnp.float32) * 0.1 + 1.0,
            "beta": jax.random.normal(keys[1], (input_dim,), jnp.float32) * 0.1,
            "running_mean": jax.random.normal(keys[2], (input_dim,), jnp.float32) * 0.1,
            "running_var": jnp.abs(jax.random.normal(keys[3], (input_dim,), jnp.float32)) * 0.1 + 0.9,
        },
        "layers": [],
    }
    c = input_dim
    for i, d in enumerate(dims):
        k0, k1, k2, k3 = keys[4 + 4 * i: 8 + 4 * i]
        params["layers"].append({
            "ln_g": jax.random.normal(k0, (c,), jnp.float32) * 0.1 + 1.0,
            "ln_b": jax.random.normal(k1, (c,), jnp.float32) * 0.1,
            # Linear stored as (in, out) for x @ W; == PyTorch (out, in).T
            "w": jax.random.normal(k2, (c, d), jnp.float32) * (1.0 / math.sqrt(c)),
            "b": jax.random.normal(k3, (d,), jnp.float32) * 0.05,
        })
        c = d
    return params


if __name__ == "__main__":
    input_dim = 16
    dims = (32, 64, 128)          # final dim 128 -> lane-dense output stores

    key = jax.random.PRNGKey(0)
    kx1, kx2, kx3, kp = jax.random.split(key, 4)
    params = init_params(kp, input_dim, dims)

    # Case 1: (batch=2, seq_len=8), f32 MXU path. Tolerance covers MXU f32
    # rounding modes while still catching any layout/semantics bug.
    x1 = jax.random.normal(kx1, (2, input_dim, 8), jnp.float32)
    out1 = jax.block_until_ready(embed_forward(x1, params, mxu_dtype=jnp.float32))
    ref1 = jax.block_until_ready(embed_reference(x1, params))
    assert out1.shape == (8, 2, dims[-1])
    assert jnp.max(jnp.abs(out1 - ref1)) < 5e-2

    # Case 2: odd batch/seq (L=5, N=3) -> tile_L == L (full-extent blocks).
    x2 = jax.random.normal(kx2, (3, input_dim, 5), jnp.float32)
    out2 = jax.block_until_ready(embed_forward(x2, params, mxu_dtype=jnp.float32))
    ref2 = jax.block_until_ready(embed_reference(x2, params))
    assert out2.shape == (5, 3, dims[-1])
    assert jnp.max(jnp.abs(out2 - ref2)) < 5e-2

    # Case 3: L=200 with tile_l=128 -> multi-block grid with a masked partial
    # edge block; f32 path tight-ish, then default bf16 MXU path (loose).
    x3 = jax.random.normal(kx3, (2, input_dim, 200), jnp.float32)
    ref3 = jax.block_until_ready(embed_reference(x3, params))
    out3 = jax.block_until_ready(
        embed_forward(x3, params, tile_l=128, mxu_dtype=jnp.float32))
    assert out3.shape == (200, 2, dims[-1])
    assert jnp.max(jnp.abs(out3 - ref3)) < 5e-2
    out3_bf16 = jax.block_until_ready(embed_forward(x3, params, tile_l=128))
    assert out3_bf16.shape == (200, 2, dims[-1])
    assert jnp.max(jnp.abs(out3_bf16 - ref3)) < 2e-1

    print("KERNEL_OK")
</pallas_src>

<mosaic_0001>
module attributes {stable_mosaic.version = 11 : i64} {
  func.func @kernel(%arg0: i32, %arg1: i32, %arg2: memref<1x16x8xf32, #tpu.memory_space<vmem>>, %arg3: memref<1x16xf32, #tpu.memory_space<vmem>>, %arg4: memref<1x16xf32, #tpu.memory_space<vmem>>, %arg5: memref<1x16xf32, #tpu.memory_space<vmem>>, %arg6: memref<1x16xf32, #tpu.memory_space<vmem>>, %arg7: memref<16x32xf32, #tpu.memory_space<vmem>>, %arg8: memref<1x32xf32, #tpu.memory_space<vmem>>, %arg9: memref<1x32xf32, #tpu.memory_space<vmem>>, %arg10: memref<1x32xf32, #tpu.memory_space<vmem>>, %arg11: memref<32x64xf32, #tpu.memory_space<vmem>>, %arg12: memref<1x64xf32, #tpu.memory_space<vmem>>, %arg13: memref<1x64xf32, #tpu.memory_space<vmem>>, %arg14: memref<1x64xf32, #tpu.memory_space<vmem>>, %arg15: memref<64x128xf32, #tpu.memory_space<vmem>>, %arg16: memref<1x128xf32, #tpu.memory_space<vmem>>, %arg17: memref<8x128xf32, #tpu.memory_space<vmem>>) attributes {dimension_semantics = [#tpu.dimension_semantics<parallel>, #tpu.dimension_semantics<parallel>], iteration_bounds = array<i64: 1, 2>, scalar_prefetch = 0 : i64, scratch_operands = 0 : i64, tpu.core_type = #tpu.core_type<tc>, window_params = [{transform_indices = @transform_0, window_bounds = array<i64: 1, 16, 8>}, {pipeline_mode = #tpu.pipeline_mode<synchronous>, transform_indices = @transform_1, window_bounds = array<i64: 1, 16>}, {pipeline_mode = #tpu.pipeline_mode<synchronous>, transform_indices = @transform_2, window_bounds = array<i64: 1, 16>}, {pipeline_mode = #tpu.pipeline_mode<synchronous>, transform_indices = @transform_3, window_bounds = array<i64: 1, 16>}, {pipeline_mode = #tpu.pipeline_mode<synchronous>, transform_indices = @transform_4, window_bounds = array<i64: 1, 16>}, {pipeline_mode = #tpu.pipeline_mode<synchronous>, transform_indices = @transform_5, window_bounds = array<i64: 16, 32>}, {pipeline_mode = #tpu.pipeline_mode<synchronous>, transform_indices = @transform_6, window_bounds = array<i64: 1, 32>}, {pipeline_mode = #tpu.pipeline_mode<synchronous>, transform_indices = @transform_7, window_bounds = array<i64: 1, 32>}, {pipeline_mode = #tpu.pipeline_mode<synchronous>, transform_indices = @transform_8, window_bounds = array<i64: 1, 32>}, {pipeline_mode = #tpu.pipeline_mode<synchronous>, transform_indices = @transform_9, window_bounds = array<i64: 32, 64>}, {pipeline_mode = #tpu.pipeline_mode<synchronous>, transform_indices = @transform_10, window_bounds = array<i64: 1, 64>}, {pipeline_mode = #tpu.pipeline_mode<synchronous>, transform_indices = @transform_11, window_bounds = array<i64: 1, 64>}, {pipeline_mode = #tpu.pipeline_mode<synchronous>, transform_indices = @transform_12, window_bounds = array<i64: 1, 64>}, {pipeline_mode = #tpu.pipeline_mode<synchronous>, transform_indices = @transform_13, window_bounds = array<i64: 64, 128>}, {pipeline_mode = #tpu.pipeline_mode<synchronous>, transform_indices = @transform_14, window_bounds = array<i64: 1, 128>}, {transform_indices = @transform_15, window_bounds = array<i64: 8, 128>}]} {
    %c0 = arith.constant 0 : index
    %c0_0 = arith.constant 0 : index
    %c0_1 = arith.constant 0 : index
    %0 = vector.load %arg2[%c0, %c0_0, %c0_1] : memref<1x16x8xf32, #tpu.memory_space<vmem>>, vector<1x16x8xf32>
    %1 = vector.shape_cast %0 : vector<1x16x8xf32> to vector<16x8xf32>
    %2 = tpu.transpose %1, [1, 0] : vector<16x8xf32> -> vector<8x16xf32>
    %c0_2 = arith.constant 0 : index
    %c0_3 = arith.constant 0 : index
    %3 = vector.load %arg3[%c0_2, %c0_3] : memref<1x16xf32, #tpu.memory_space<vmem>>, vector<1x16xf32>
    %4 = vector.broadcast %3 : vector<1x16xf32> to vector<8x16xf32>
    %5 = arith.mulf %2, %4 : vector<8x16xf32>
    %c0_4 = arith.constant 0 : index
    %c0_5 = arith.constant 0 : index
    %6 = vector.load %arg4[%c0_4, %c0_5] : memref<1x16xf32, #tpu.memory_space<vmem>>, vector<1x16xf32>
    %7 = vector.broadcast %6 : vector<1x16xf32> to vector<8x16xf32>
    %8 = arith.addf %5, %7 : vector<8x16xf32>
    %cst = arith.constant dense<0.000000e+00> : vector<8xf32>
    %9 = vector.multi_reduction <add>, %8, %cst [1] : vector<8x16xf32> to vector<8xf32>
    %10 = vector.shape_cast %9 : vector<8xf32> to vector<8x1xf32>
    %11 = arith.mulf %8, %8 : vector<8x16xf32>
    %cst_6 = arith.constant dense<0.000000e+00> : vector<8xf32>
    %12 = vector.multi_reduction <add>, %11, %cst_6 [1] : vector<8x16xf32> to vector<8xf32>
    %13 = vector.shape_cast %12 : vector<8xf32> to vector<8x1xf32>
    %cst_7 = arith.constant 6.250000e-02 : f32
    %14 = vector.broadcast %cst_7 : f32 to vector<8x1xf32>
    %15 = arith.mulf %10, %14 : vector<8x1xf32>
    %cst_8 = arith.constant 6.250000e-02 : f32
    %16 = vector.broadcast %cst_8 : f32 to vector<8x1xf32>
    %17 = arith.mulf %13, %16 : vector<8x1xf32>
    %18 = arith.mulf %15, %15 : vector<8x1xf32>
    %19 = arith.subf %17, %18 : vector<8x1xf32>
    %cst_9 = arith.constant 0.000000e+00 : f32
    %20 = vector.broadcast %cst_9 : f32 to vector<8x1xf32>
    %21 = arith.maximumf %19, %20 : vector<8x1xf32>
    %22 = vector.broadcast %15 : vector<8x1xf32> to vector<8x16xf32>
    %23 = arith.subf %8, %22 : vector<8x16xf32>
    %cst_10 = arith.constant 9.99999974E-6 : f32
    %24 = vector.broadcast %cst_10 : f32 to vector<8x1xf32>
    %25 = arith.addf %21, %24 : vector<8x1xf32>
    %26 = math.rsqrt %25 : vector<8x1xf32>
    %27 = vector.broadcast %26 : vector<8x1xf32> to vector<8x16xf32>
    %28 = arith.mulf %23, %27 : vector<8x16xf32>
    %c0_11 = arith.constant 0 : index
    %c0_12 = arith.constant 0 : index
    %29 = vector.load %arg5[%c0_11, %c0_12] : memref<1x16xf32, #tpu.memory_space<vmem>>, vector<1x16xf32>
    %30 = vector.broadcast %29 : vector<1x16xf32> to vector<8x16xf32>
    %31 = arith.mulf %28, %30 : vector<8x16xf32>
    %c0_13 = arith.constant 0 : index
    %c0_14 = arith.constant 0 : index
    %32 = vector.load %arg6[%c0_13, %c0_14] : memref<1x16xf32, #tpu.memory_space<vmem>>, vector<1x16xf32>
    %33 = vector.broadcast %32 : vector<1x16xf32> to vector<8x16xf32>
    %34 = arith.addf %31, %33 : vector<8x16xf32>
    %c0_15 = arith.constant 0 : index
    %c0_16 = arith.constant 0 : index
    %35 = vector.load %arg7[%c0_15, %c0_16] : memref<16x32xf32, #tpu.memory_space<vmem>>, vector<16x32xf32>
    %cst_17 = arith.constant dense<0.000000e+00> : vector<8x32xf32>
    %36 = tpu.matmul %34, %35, %cst_17 {dimension_numbers = #tpu.dot_dimension_numbers<[1], [0], [0], [1], [0, 0, 1, 1], [], []>} : vector<8x16xf32>, vector<16x32xf32>, vector<8x32xf32> -> vector<8x32xf32>
    %c0_18 = arith.constant 0 : index
    %c0_19 = arith.constant 0 : index
    %37 = vector.load %arg8[%c0_18, %c0_19] : memref<1x32xf32, #tpu.memory_space<vmem>>, vector<1x32xf32>
    %38 = vector.broadcast %37 : vector<1x32xf32> to vector<8x32xf32>
    %39 = arith.addf %36, %38 : vector<8x32xf32>
    %cst_20 = arith.constant 5.000000e-01 : f32
    %40 = vector.broadcast %cst_20 : f32 to vector<8x32xf32>
    %41 = arith.mulf %40, %39 : vector<8x32xf32>
    %cst_21 = arith.constant 0.707106769 : f32
    %42 = vector.broadcast %cst_21 : f32 to vector<8x32xf32>
    %43 = arith.mulf %39, %42 : vector<8x32xf32>
    %44 = math.erf %43 : vector<8x32xf32>
    %cst_22 = arith.constant 1.000000e+00 : f32
    %45 = vector.broadcast %cst_22 : f32 to vector<8x32xf32>
    %46 = arith.addf %45, %44 : vector<8x32xf32>
    %47 = arith.mulf %41, %46 : vector<8x32xf32>
    %cst_23 = arith.constant dense<0.000000e+00> : vector<8xf32>
    %48 = vector.multi_reduction <add>, %47, %cst_23 [1] : vector<8x32xf32> to vector<8xf32>
    %49 = vector.shape_cast %48 : vector<8xf32> to vector<8x1xf32>
    %50 = arith.mulf %47, %47 : vector<8x32xf32>
    %cst_24 = arith.constant dense<0.000000e+00> : vector<8xf32>
    %51 = vector.multi_reduction <add>, %50, %cst_24 [1] : vector<8x32xf32> to vector<8xf32>
    %52 = vector.shape_cast %51 : vector<8xf32> to vector<8x1xf32>
    %cst_25 = arith.constant 3.125000e-02 : f32
    %53 = vector.broadcast %cst_25 : f32 to vector<8x1xf32>
    %54 = arith.mulf %49, %53 : vector<8x1xf32>
    %cst_26 = arith.constant 3.125000e-02 : f32
    %55 = vector.broadcast %cst_26 : f32 to vector<8x1xf32>
    %56 = arith.mulf %52, %55 : vector<8x1xf32>
    %57 = arith.mulf %54, %54 : vector<8x1xf32>
    %58 = arith.subf %56, %57 : vector<8x1xf32>
    %cst_27 = arith.constant 0.000000e+00 : f32
    %59 = vector.broadcast %cst_27 : f32 to vector<8x1xf32>
    %60 = arith.maximumf %58, %59 : vector<8x1xf32>
    %61 = vector.broadcast %54 : vector<8x1xf32> to vector<8x32xf32>
    %62 = arith.subf %47, %61 : vector<8x32xf32>
    %cst_28 = arith.constant 9.99999974E-6 : f32
    %63 = vector.broadcast %cst_28 : f32 to vector<8x1xf32>
    %64 = arith.addf %60, %63 : vector<8x1xf32>
    %65 = math.rsqrt %64 : vector<8x1xf32>
    %66 = vector.broadcast %65 : vector<8x1xf32> to vector<8x32xf32>
    %67 = arith.mulf %62, %66 : vector<8x32xf32>
    %c0_29 = arith.constant 0 : index
    %c0_30 = arith.constant 0 : index
    %68 = vector.load %arg9[%c0_29, %c0_30] : memref<1x32xf32, #tpu.memory_space<vmem>>, vector<1x32xf32>
    %69 = vector.broadcast %68 : vector<1x32xf32> to vector<8x32xf32>
    %70 = arith.mulf %67, %69 : vector<8x32xf32>
    %c0_31 = arith.constant 0 : index
    %c0_32 = arith.constant 0 : index
    %71 = vector.load %arg10[%c0_31, %c0_32] : memref<1x32xf32, #tpu.memory_space<vmem>>, vector<1x32xf32>
    %72 = vector.broadcast %71 : vector<1x32xf32> to vector<8x32xf32>
    %73 = arith.addf %70, %72 : vector<8x32xf32>
    %c0_33 = arith.constant 0 : index
    %c0_34 = arith.constant 0 : index
    %74 = vector.load %arg11[%c0_33, %c0_34] : memref<32x64xf32, #tpu.memory_space<vmem>>, vector<32x64xf32>
    %cst_35 = arith.constant dense<0.000000e+00> : vector<8x64xf32>
    %75 = tpu.matmul %73, %74, %cst_35 {dimension_numbers = #tpu.dot_dimension_numbers<[1], [0], [0], [1], [0, 0, 1, 1], [], []>} : vector<8x32xf32>, vector<32x64xf32>, vector<8x64xf32> -> vector<8x64xf32>
    %c0_36 = arith.constant 0 : index
    %c0_37 = arith.constant 0 : index
    %76 = vector.load %arg12[%c0_36, %c0_37] : memref<1x64xf32, #tpu.memory_space<vmem>>, vector<1x64xf32>
    %77 = vector.broadcast %76 : vector<1x64xf32> to vector<8x64xf32>
    %78 = arith.addf %75, %77 : vector<8x64xf32>
    %cst_38 = arith.constant 5.000000e-01 : f32
    %79 = vector.broadcast %cst_38 : f32 to vector<8x64xf32>
    %80 = arith.mulf %79, %78 : vector<8x64xf32>
    %cst_39 = arith.constant 0.707106769 : f32
    %81 = vector.broadcast %cst_39 : f32 to vector<8x64xf32>
    %82 = arith.mulf %78, %81 : vector<8x64xf32>
    %83 = math.erf %82 : vector<8x64xf32>
    %cst_40 = arith.constant 1.000000e+00 : f32
    %84 = vector.broadcast %cst_40 : f32 to vector<8x64xf32>
    %85 = arith.addf %84, %83 : vector<8x64xf32>
    %86 = arith.mulf %80, %85 : vector<8x64xf32>
    %cst_41 = arith.constant dense<0.000000e+00> : vector<8xf32>
    %87 = vector.multi_reduction <add>, %86, %cst_41 [1] : vector<8x64xf32> to vector<8xf32>
    %88 = vector.shape_cast %87 : vector<8xf32> to vector<8x1xf32>
    %89 = arith.mulf %86, %86 : vector<8x64xf32>
    %cst_42 = arith.constant dense<0.000000e+00> : vector<8xf32>
    %90 = vector.multi_reduction <add>, %89, %cst_42 [1] : vector<8x64xf32> to vector<8xf32>
    %91 = vector.shape_cast %90 : vector<8xf32> to vector<8x1xf32>
    %cst_43 = arith.constant 1.562500e-02 : f32
    %92 = vector.broadcast %cst_43 : f32 to vector<8x1xf32>
    %93 = arith.mulf %88, %92 : vector<8x1xf32>
    %cst_44 = arith.constant 1.562500e-02 : f32
    %94 = vector.broadcast %cst_44 : f32 to vector<8x1xf32>
    %95 = arith.mulf %91, %94 : vector<8x1xf32>
    %96 = arith.mulf %93, %93 : vector<8x1xf32>
    %97 = arith.subf %95, %96 : vector<8x1xf32>
    %cst_45 = arith.constant 0.000000e+00 : f32
    %98 = vector.broadcast %cst_45 : f32 to vector<8x1xf32>
    %99 = arith.maximumf %97, %98 : vector<8x1xf32>
    %100 = vector.broadcast %93 : vector<8x1xf32> to vector<8x64xf32>
    %101 = arith.subf %86, %100 : vector<8x64xf32>
    %cst_46 = arith.constant 9.99999974E-6 : f32
    %102 = vector.broadcast %cst_46 : f32 to vector<8x1xf32>
    %103 = arith.addf %99, %102 : vector<8x1xf32>
    %104 = math.rsqrt %103 : vector<8x1xf32>
    %105 = vector.broadcast %104 : vector<8x1xf32> to vector<8x64xf32>
    %106 = arith.mulf %101, %105 : vector<8x64xf32>
    %c0_47 = arith.constant 0 : index
    %c0_48 = arith.constant 0 : index
    %107 = vector.load %arg13[%c0_47, %c0_48] : memref<1x64xf32, #tpu.memory_space<vmem>>, vector<1x64xf32>
    %108 = vector.broadcast %107 : vector<1x64xf32> to vector<8x64xf32>
    %109 = arith.mulf %106, %108 : vector<8x64xf32>
    %c0_49 = arith.constant 0 : index
    %c0_50 = arith.constant 0 : index
    %110 = vector.load %arg14[%c0_49, %c0_50] : memref<1x64xf32, #tpu.memory_space<vmem>>, vector<1x64xf32>
    %111 = vector.broadcast %110 : vector<1x64xf32> to vector<8x64xf32>
    %112 = arith.addf %109, %111 : vector<8x64xf32>
    %c0_51 = arith.constant 0 : index
    %c0_52 = arith.constant 0 : index
    %113 = vector.load %arg15[%c0_51, %c0_52] : memref<64x128xf32, #tpu.memory_space<vmem>>, vector<64x128xf32>
    %cst_53 = arith.constant dense<0.000000e+00> : vector<8x128xf32>
    %114 = tpu.matmul %112, %113, %cst_53 {dimension_numbers = #tpu.dot_dimension_numbers<[1], [0], [0], [1], [0, 0, 1, 1], [], []>} : vector<8x64xf32>, vector<64x128xf32>, vector<8x128xf32> -> vector<8x128xf32>
    %c0_54 = arith.constant 0 : index
    %c0_55 = arith.constant 0 : index
    %115 = vector.load %arg16[%c0_54, %c0_55] : memref<1x128xf32, #tpu.memory_space<vmem>>, vector<1x128xf32>
    %116 = vector.broadcast %115 : vector<1x128xf32> to vector<8x128xf32>
    %117 = arith.addf %114, %116 : vector<8x128xf32>
    %cst_56 = arith.constant 5.000000e-01 : f32
    %118 = vector.broadcast %cst_56 : f32 to vector<8x128xf32>
    %119 = arith.mulf %118, %117 : vector<8x128xf32>
    %cst_57 = arith.constant 0.707106769 : f32
    %120 = vector.broadcast %cst_57 : f32 to vector<8x128xf32>
    %121 = arith.mulf %117, %120 : vector<8x128xf32>
    %122 = math.erf %121 : vector<8x128xf32>
    %cst_58 = arith.constant 1.000000e+00 : f32
    %123 = vector.broadcast %cst_58 : f32 to vector<8x128xf32>
    %124 = arith.addf %123, %122 : vector<8x128xf32>
    %125 = arith.mulf %119, %124 : vector<8x128xf32>
    %c0_59 = arith.constant 0 : index
    %c0_60 = arith.constant 0 : index
    %126 = vector.load %arg17[%c0_59, %c0_60] : memref<8x128xf32, #tpu.memory_space<vmem>>, vector<8x128xf32>
    tpu.vector_store %arg17[%c0_59, %c0_60], %125 {strides = array<i32>} : memref<8x128xf32, #tpu.memory_space<vmem>>, vector<8x128xf32>,
    return
  }
  func.func @transform_0(%arg0: i32, %arg1: i32) -> (i32, i32, i32) {
    %c0_i32 = arith.constant 0 : i32
    %c0_i32_0 = arith.constant 0 : i32
    return %arg1, %c0_i32, %arg0 : i32, i32, i32
  }
  func.func @transform_1(%arg0: i32, %arg1: i32) -> (i32, i32) {
    %c0_i32 = arith.constant 0 : i32
    %c0_i32_0 = arith.constant 0 : i32
    %c0_i32_1 = arith.constant 0 : i32
    return %c0_i32, %c0_i32_0 : i32, i32
  }
  func.func @transform_2(%arg0: i32, %arg1: i32) -> (i32, i32) {
    %c0_i32 = arith.constant 0 : i32
    %c0_i32_0 = arith.constant 0 : i32
    %c0_i32_1 = arith.constant 0 : i32
    return %c0_i32, %c0_i32_0 : i32, i32
  }
  func.func @transform_3(%arg0: i32, %arg1: i32) -> (i32, i32) {
    %c0_i32 = arith.constant 0 : i32
    %c0_i32_0 = arith.constant 0 : i32
    %c0_i32_1 = arith.constant 0 : i32
    return %c0_i32, %c0_i32_0 : i32, i32
  }
  func.func @transform_4(%arg0: i32, %arg1: i32) -> (i32, i32) {
    %c0_i32 = arith.constant 0 : i32
    %c0_i32_0 = arith.constant 0 : i32
    %c0_i32_1 = arith.constant 0 : i32
    return %c0_i32, %c0_i32_0 : i32, i32
  }
  func.func @transform_5(%arg0: i32, %arg1: i32) -> (i32, i32) {
    %c0_i32 = arith.constant 0 : i32
    %c0_i32_0 = arith.constant 0 : i32
    %c0_i32_1 = arith.constant 0 : i32
    return %c0_i32, %c0_i32_0 : i32, i32
  }
  func.func @transform_6(%arg0: i32, %arg1: i32) -> (i32, i32) {
    %c0_i32 = arith.constant 0 : i32
    %c0_i32_0 = arith.constant 0 : i32
    %c0_i32_1 = arith.constant 0 : i32
    return %c0_i32, %c0_i32_0 : i32, i32
  }
  func.func @transform_7(%arg0: i32, %arg1: i32) -> (i32, i32) {
    %c0_i32 = arith.constant 0 : i32
    %c0_i32_0 = arith.constant 0 : i32
    %c0_i32_1 = arith.constant 0 : i32
    return %c0_i32, %c0_i32_0 : i32, i32
  }
  func.func @transform_8(%arg0: i32, %arg1: i32) -> (i32, i32) {
    %c0_i32 = arith.constant 0 : i32
    %c0_i32_0 = arith.constant 0 : i32
    %c0_i32_1 = arith.constant 0 : i32
    return %c0_i32, %c0_i32_0 : i32, i32
  }
  func.func @transform_9(%arg0: i32, %arg1: i32) -> (i32, i32) {
    %c0_i32 = arith.constant 0 : i32
    %c0_i32_0 = arith.constant 0 : i32
    %c0_i32_1 = arith.constant 0 : i32
    return %c0_i32, %c0_i32_0 : i32, i32
  }
  func.func @transform_10(%arg0: i32, %arg1: i32) -> (i32, i32) {
    %c0_i32 = arith.constant 0 : i32
    %c0_i32_0 = arith.constant 0 : i32
    %c0_i32_1 = arith.constant 0 : i32
    return %c0_i32, %c0_i32_0 : i32, i32
  }
  func.func @transform_11(%arg0: i32, %arg1: i32) -> (i32, i32) {
    %c0_i32 = arith.constant 0 : i32
    %c0_i32_0 = arith.constant 0 : i32
    %c0_i32_1 = arith.constant 0 : i32
    return %c0_i32, %c0_i32_0 : i32, i32
  }
  func.func @transform_12(%arg0: i32, %arg1: i32) -> (i32, i32) {
    %c0_i32 = arith.constant 0 : i32
    %c0_i32_0 = arith.constant 0 : i32
    %c0_i32_1 = arith.constant 0 : i32
    return %c0_i32, %c0_i32_0 : i32, i32
  }
  func.func @transform_13(%arg0: i32, %arg1: i32) -> (i32, i32) {
    %c0_i32 = arith.constant 0 : i32
    %c0_i32_0 = arith.constant 0 : i32
    %c0_i32_1 = arith.constant 0 : i32
    return %c0_i32, %c0_i32_0 : i32, i32
  }
  func.func @transform_14(%arg0: i32, %arg1: i32) -> (i32, i32) {
    %c0_i32 = arith.constant 0 : i32
    %c0_i32_0 = arith.constant 0 : i32
    %c0_i32_1 = arith.constant 0 : i32
    return %c0_i32, %c0_i32_0 : i32, i32
  }
  func.func @transform_15(%arg0: i32, %arg1: i32) -> (i32, i32) {
    %c0_i32 = arith.constant 0 : i32
    return %arg0, %arg1 : i32, i32
  }
}

</mosaic_0001>

<bundles_post_ra>
// kernel: tpu_custom_call.1
= control target key start
LH: loop header
LB: loop body
LE: loop exit
PB: predicated region body
PF: predicated region fallthrough
CT: control target
= control target key end

     0   :  { %s1490_s0 = inlined_call_operand.vmem [shape: f32[2,16,8], index: 0, kind: input, shape index: {}]   ;;  %s1491_s1 = inlined_call_operand.vmem [shape: f32[1,16], index: 1, kind: input, shape index: {}]   ;;  %s1492_s2 = inlined_call_operand.vmem [shape: f32[1,16], index: 2, kind: input, shape index: {}]   ;;  %s1493_s3 = inlined_call_operand.vmem [shape: f32[1,16], index: 3, kind: input, shape index: {}]   ;;  %s1494_s4 = inlined_call_operand.vmem [shape: f32[1,16], index: 4, kind: input, shape index: {}]   ;;  %s1495_s5 = inlined_call_operand.vmem [shape: f32[16,32], index: 5, kind: input, shape index: {}]   ;;  %s1496_s6 = inlined_call_operand.vmem [shape: f32[1,32], index: 6, kind: input, shape index: {}]   ;;  %s1497_s7 = inlined_call_operand.vmem [shape: f32[1,32], index: 7, kind: input, shape index: {}]   ;;  %s1498_s8 = inlined_call_operand.vmem [shape: f32[1,32], index: 8, kind: input, shape index: {}]   ;;  %s1499_s9 = inlined_call_operand.vmem [shape: f32[32,64], index: 9, kind: input, shape index: {}]   ;;  %s1500_s10 = inlined_call_operand.vmem [shape: f32[1,64], index: 10, kind: input, shape index: {}]   ;;  %s1501_s11 = inlined_call_operand.vmem [shape: f32[1,64], index: 11, kind: input, shape index: {}]   ;;  %s1502_s12 = inlined_call_operand.vmem [shape: f32[1,64], index: 12, kind: input, shape index: {}]   ;;  %s1503_s13 = inlined_call_operand.hbm [shape: f32[64,128], index: 13, kind: input, shape index: {}]   ;;  %s1504_s14 = inlined_call_operand.vmem [shape: f32[1,128], index: 14, kind: input, shape index: {}]   ;;  %s1505_s15 = inlined_call_operand.hbm [shape: f32[8,256], index: 15, kind: output, shape index: {}]  }
   0x1   :  { %1512 = sst [smem:[#allocation12_spill]] %s1490_s0 }
   0x2   :  { %1513 = sst [smem:[#allocation13_spill]] %s1491_s1 }
   0x3   :  { %1514 = sst [smem:[#allocation14_spill]] %s1503_s13 }
   0x4   :  { %1515 = sst [smem:[#allocation15_spill]] %s1505_s15 }
   0x5   :  { %20 = vsyncpa [#allocation3], 0 }
   0x6   :  { %21 = vsyncpa [#allocation4], 0 }
   0x7   :  { %23 = vsyncpa [#allocation4 + $0x1], 0  ;;  %s1330_s18 = smov 0   ;;  %s1332_s19 = smov 0  }
   0x8   :  { %s1334_s20 = smov 0   ;;  %s1336_s21 = smov 0  }
   0x9   :  { %s1338_s22 = smov 0   ;;  %s1340_s23 = smov 0  }
   0xa LB: > { %1516 = sst [smem:[#allocation8_spill]] %s1225_s18  ;;  %s1020_s24 = sadd.s32 4294967295, %s1245_s23   ;;  %s1245_s23 = sphi %s1340_s23, %s29_s23   ;;  %s1241_s22 = sphi %s1338_s22, %s1529_s22   ;;  %s1237_s21 = sphi %s1336_s21, %s1528_s21   ;;  %s1233_s20 = sphi %s1334_s20, %s1532_s20   ;;  %s1229_s19 = sphi %s1332_s19, %s1531_s19   ;;  %s1225_s18 = sphi %s1330_s18, %s1530_s18  }
   0xb   : > { %1517 = sst [smem:[#allocation9_spill]] %s1241_s22  ;;  %s1021_s25 = sadd.s32 4294967294, %s1245_s23  }
   0xc   : > { %s38_s26 = sadd.s32 1, %s1241_s22  ;;  %s372_s27 = sadd.s32 1, %s1233_s20 }
   0xd   : > { %p39_p0 = scmp.ge.s32.totalorder %s38_s26, 2  ;;  %p382_p1 = scmp.ne.s32.totalorder %s1233_s20, %s1229_s19 }
   0xe   : > { %p383_p2 = scmp.eq.s32.totalorder %s1020_s24, 1  ;;  %p388_p3 = scmp.ne.s32.totalorder %s1229_s19, %s1225_s18 }
   0xf   : > { %s1534_s26 = smov (%p39_p0, %s38_s26), 0  ;;  %p389_p5 = scmp.eq.s32.totalorder %s1021_s25, 1 }
  0x10   : > { %1518 = sst [smem:[#allocation10_spill]] %s1534_s26  ;;  %p1370_p4 = por %p383_p2, %p382_p1 }
  0x11   : > { %s368_s29 = ssub.s32 %s1241_s22, %s1534_s26  ;;  %p1022_p6 = scmp.ge.s32.totalorder %s1245_s23, 1 }
  0x12   : > { %s1519_s28 = scalar_select %p1370_p4, 1, 0 }
  0x13   : > { %p370_p7 = scmp.eq.s32.totalorder %s368_s29, 0  ;;  %p1377_p8 = por %p389_p5, %p388_p3 }
  0x14   : > { %1520 = sst [smem:[#allocation11_spill]] %s1519_s28  ;;  %p396_p9 = scmp.lt.s32.totalorder %s1245_s23, 3 }
  0x15   : > { %s1383_s16 = scalar_select %p370_p7, %s1233_s20, %s372_s27  }
  0x16   : > { %p397_p10 = pnand %p1022_p6, %p396_p9  ;;  %p1055_p11 = scmp.eq.s32.totalorder %s1020_s24, 0 }
  0x17   : > { %s1522_s13 = sld [smem:[#allocation14_spill]]  ;;  %s1247_s28 = smov [#allocation2]  }
  0x18   : > { %p1047_p12 = pneg %p397_p10  ;;  %s445_s25 = sshll.u32 %s1247_s28, 4  ;;  %s446_s25 = int_to_ptr.vmem [resolvable:$true] %s445_s25 }
  0x19   : > { %s1248_s29 = smov 128   ;;  %s1249_s26 = smov 8  }
  0x1a   : > { %p1048_p13 = pnand %p1055_p11, %p1047_p12  ;;  %475 = sbr.rel (%p397_p10) target bundleno = 1220 (0x4c4), region = 80 }
  0x1d   : > { %s443_s15 = sshll.u32 %s1522_s13, 4  ;;  %s444_s15 = int_to_ptr.hbm [resolvable:$true] %s443_s15 }
  0x1e   : > { %1050 = dma.hbm_to_vmem [thread:$0]  (!%p1048_p13), %s444_s15, 1024, %s446_s25, [#allocation3], %s1248_s29, %s1248_s29, %s1249_s26  }
  0x1f   : > { %1216 = dma.done.wait (%p1055_p11), [#allocation3], 1024  }
  0x20   : > { %1218 = vsyncadd (%p1055_p11), [#allocation3], 4294966272  ;;  %p527_p0 = scmp.lt.s32.totalorder %s1237_s21, 1  ;;  %s1523_s0 = sld [smem:[#allocation12_spill]]  ;;  %v1111_v3 = vld [vmem:[%s1492_s2] ss:$0 sm:$0xff] }
  0x21   : > { %s1524_s1 = sld [smem:[#allocation13_spill]]  ;;  %vm579_vm0 = vcmask 130048   ;;  %v616_v11 = vld [vmem:[%s1495_s5 + $0x8] sm:$0xff]  ;;  %v615_v12 = vld [vmem:[%s1495_s5] sm:$0xff]  ;;  %vm688_vm8 = vcmask 261120   ;;  %s524_s28 = sand.u32 1, %s1229_s19  }
  0x22   : > { %s528_s24 = scalar_select %p527_p0, %s1237_s21, 1  ;;  %638 = vmatpush.msra.mxu0 %v616_v11  ;;  %v1112_v27 = vld [vmem:[%s1493_s3] ss:$0 sm:$0xff] }
  0x23   : > { %v1113_v30 = vld [vmem:[%s1494_s4] ss:$0 sm:$0xff]  ;;  %s1027_s15 = sshll.u32 %s524_s28, 3  ;;  %s1037_s26 = sshll.u32 %s1237_s21, 3 }
  0x24   : > { %s1040_s27 = sshll.u32 %s528_s24, 4  ;;  %639 = vmatpush.msra.mxu0 %v615_v12  ;;  %v1114_v33 = vld [vmem:[%s1496_s6] ss:$0 sm:$0xff]  ;;  %s1525_s13 = sld [smem:[#allocation15_spill]] }
  0x25   : > { %s916_s21 = scalar_lea.sflag [#allocation4], %s524_s28 }
  0x26   : > { %s534_s17 = scalar_lea.vmem %s1523_s0, %s1040_s27  ;;  %s526_s27 = scalar_lea.vmem [#allocation5], %s1027_s15 }
  0x27   : > { %v535_v0 = vld [vmem:[%s534_s17] sm:$0xff]  ;;  %v536_v1 = vld [vmem:[%s534_s17 + $0x8] sm:$0xff]  ;;  %s930_s18 = sshll.u32 %s526_s27, 4  ;;  %s931_s18 = int_to_ptr.vmem [resolvable:$true] %s930_s18 }
  0x28   : > { %537 = vxpose.xlu0.b32.start [1/2] (short) (narrow) %v535_v0, 8  ;;  %v1110_v2 = vld [vmem:[%s1524_s1] ss:$0 sm:$0xff] }
  0x2a   : > { %s928_s29 = scalar_lea.hbm %s1525_s13, %s1037_s26  ;;  %s1183_s15 = scalar_lea.hbm %s1525_s13, 16 }
  0x2b   : > { %s932_s17 = sshll.u32 %s928_s29, 4  ;;  %s933_s17 = int_to_ptr.hbm [resolvable:$true] %s932_s17 }
  0x2c   : > { %s1177_s0 = sshra.s32 %s933_s17, 4  ;;  %s1178_s0 = int_to_ptr.hbm [resolvable:$true] %s1177_s0 }
  0x2d   : > { %s1179_s1 = scalar_lea.hbm %s1178_s0, 8  ;;  %p1184_p5 = scmp.lt.s32.totalorder %s1178_s0, %s1525_s13 }
  0x2e   : > { %p1180_p1 = scmp.ne.s32.totalorder %s1178_s0, %s1179_s1  ;;  %p1185_p6 = scmp.lt.s32.totalorder %s1183_s15, %s1179_s1 }
  0x30   : > { %538 = vxpose.xlu0.b32.end [2/2] (short) (narrow) %v536_v1, 8  ;;  %p1181_p2 = pnand %p1180_p1, %p1370_p4  ;;  %p1186_p7 = por %p1185_p6, %p1184_p5 }
  0x32   : > { %p1182_p3 = pneg %p1181_p2 }
  0x34   : > { %p1187_p9 = pnand %p1186_p7, %p1182_p3 }
  0xcc   : > { %v553_v4 = vpop.trf.xlu0 }
  0xcd   : > { %v573_v5 = vmul.f32 %v1110_v2, %v553_v4 }
  0xcf   : > { %v578_v6 = vadd.f32 %v1111_v3, %v573_v5 }
  0xd1   : > { %v580_v7 = vsel %vm579_vm0, %v578_v6, 0.0  ;;  %v583_v8 = vmul.f32 %v578_v6, %v578_v6 }
  0xd2   : > { %581 = vadd.xlane.f32.xlu1 %v580_v7 }
  0xd3   : > { %v584_v9 = vsel %vm579_vm0, %v583_v8, 0.0 }
  0xda   : > { %585 = vadd.xlane.f32.xlu1 %v584_v9 }
 0x145   : > { %v582_v10 = vpop.xlane.xlu1 %581 }
 0x146   : > { %v587_v13 = vmul.f32 0.0625, %v582_v10 }
 0x148   : > { %v589_v15 = vmul.f32 %v587_v13, %v587_v13  ;;  %v592_v26 = vsub.f32 %v578_v6, %v587_v13 }
 0x14d   : > { %v586_v14 = vpop.xlane.xlu1 %585 }
 0x14e   : > { %v588_v16 = vmul.f32 0.0625, %v586_v14 }
 0x150   : > { %v590_v17 = vsub.f32 %v588_v16, %v589_v15  ;;  %v727_v15 = vld [vmem:[%s1499_s9 + $0x18] sm:$0xff]  ;;  %v726_v16 = vld [vmem:[%s1499_s9 + $0x10] sm:$0xff] }
 0x151   : > { %747 = vmatpush.msra.mxu1 %v727_v15 }
 0x152   : > { %v591_v18 = vmax.f32 %v590_v17, 0.0  ;;  %v725_v17 = vld [vmem:[%s1499_s9 + $0x8] sm:$0xff] }
 0x153   : > { %748 = vmatpush.msra.mxu1 %v726_v16 }
 0x154   : > { %v593_v19 = vadd.f32 1e-05, %v591_v18  ;;  %v724_v18 = vld [vmem:[%s1499_s9] sm:$0xff] }
 0x155   : > { %749 = vmatpush.msra.mxu1 %v725_v17 }
 0x156   : > { %1121 = vrsqrt.f32 %v593_v19  ;;  %vm600_vm2 = vweird.f32 %v593_v19 }
 0x157   : > { %750 = vmatpush.msra.mxu1 %v724_v18 }
 0x15c   : > { %v1122_v20 = vpop.eup %1121 }
 0x15d   : > { %v595_v21 = vmul.f32 %v1122_v20, %v593_v19  ;;  %vm601_vm1 = vweird.f32 %v1122_v20 }
 0x15e   : > { %vm602_vm3 = vmor %vm600_vm2, %vm601_vm1 }
 0x15f   : > { %v596_v22 = vmul.f32 %v1122_v20, %v595_v21 }
 0x161   : > { %v597_v23 = vmul.f32 0.5, %v596_v22 }
 0x163   : > { %v598_v24 = vsub.f32 1.5, %v597_v23 }
 0x165   : > { %v599_v25 = vmul.f32 %v1122_v20, %v598_v24 }
 0x167   : > { %v603_v28 = vsel %vm602_vm3, %v1122_v20, %v599_v25 }
 0x168   : > { %v604_v29 = vmul.f32 %v603_v28, %v592_v26 }
 0x16a   : > { %v609_v31 = vmul.f32 %v1112_v27, %v604_v29 }
 0x16c   : > { %v614_v32 = vadd.f32 %v1113_v30, %v609_v31 }
 0x16e   : > { %1030 = vmatmul.msk.f32.vlgmr.msra.gmra.mxu0 %vm579_vm0, %v614_v32  ;;  %vm799_vm0 = vcmask 523264  }
 0x1eb   : > { %v641_v34 = vpop.f32.mrf.mxu0 }
 0x1ec   : > { %v642_v35 = vadd.f32 %v1114_v33, %v641_v34  ;;  %v1115_v33 = vld [vmem:[%s1497_s7] ss:$0 sm:$0xff] }
 0x1ee   : > { %v645_v36 = vmul.f32 0.70710677, %v642_v35  ;;  %v644_v8 = vmul.f32 0.5, %v642_v35 }
 0x1f0   : > { %v646_v37 = vmul.f32 %v645_v36, %v645_v36 }
 0x1f2   : > { %v647_v38 = vmin.f32 %v646_v37, 16.0 }
 0x1f4   : > { %v648_v39 = vmul.f32 2.1237322e-06, %v647_v38  ;;  %v659_v40 = vmul.f32 3.8918573e-05, %v647_v38 }
 0x1f6   : > { %v649_v41 = vadd.f32 0.00028619796, %v648_v39  ;;  %v660_v42 = vadd.f32 0.001143296, %v659_v40  ;;  %v1117_v39 = vld [vmem:[%s1500_s10] ss:$0 sm:$0xff] }
 0x1f8   : > { %v650_v43 = vmul.f32 %v649_v41, %v647_v38  ;;  %v661_v44 = vmul.f32 %v660_v42, %v647_v38 }
 0x1fa   : > { %v662_v45 = vadd.f32 0.014752088, %v661_v44  ;;  %v651_v46 = vadd.f32 0.0036580483, %v650_v43 }
 0x1fc   : > { %v663_v47 = vmul.f32 %v662_v45, %v647_v38  ;;  %v652_v49 = vmul.f32 %v651_v46, %v647_v38 }
 0x1fe   : > { %v664_v48 = vadd.f32 0.112945676, %v663_v47  ;;  %v653_v52 = vadd.f32 0.05243302, %v652_v49 }
 0x200   : > { %v665_v50 = vmul.f32 %v664_v48, %v647_v38  ;;  %v654_v55 = vmul.f32 %v653_v52, %v647_v38 }
 0x202   : > { %v666_v51 = vadd.f32 0.4994258, %v665_v50  ;;  %v655_v56 = vadd.f32 0.18741608, %v654_v55 }
 0x204   : > { %v667_v53 = vmul.f32 %v666_v51, %v647_v38  ;;  %v656_v58 = vmul.f32 %v655_v56, %v647_v38 }
 0x206   : > { %v668_v54 = vadd.f32 1.0, %v667_v53  ;;  %v657_v62 = vadd.f32 1.1283791, %v656_v58 }
 0x208   : > { %1123 = vrcp.f32 %v668_v54  ;;  %v680_v61 = vand.u32 2147483648, %v668_v54  ;;  %v678_v0 = vand.u32 2147483647, %v668_v54  ;;  %vm674_vm5 = vweird.f32 %v668_v54 }
 0x209   : > { %v658_v3 = vmul.f32 %v657_v62, %v645_v36  ;;  %v1116_v36 = vld [vmem:[%s1498_s8] ss:$0 sm:$0xff] }
 0x20a   : > { %v681_v2 = vor.u32 1.1754944e-38, %v680_v61  ;;  %vm679_vm7 = vcmp.eq.f32.partialorder %v678_v0, 8.507059e+37 }
 0x20e   : > { %v1124_v57 = vpop.eup %1123 }
 0x20f   : > { %v670_v59 = vmul.f32 %v1124_v57, %v668_v54  ;;  %vm675_vm4 = vweird.f32 %v1124_v57 }
 0x210   : > { %vm676_vm6 = vmor %vm674_vm5, %vm675_vm4 }
 0x211   : > { %v671_v60 = vsub.f32 1.0, %v670_v59 }
 0x213   : > { %v672_v63 = vmul.f32 %v1124_v57, %v671_v60 }
 0x215   : > { %v673_v1 = vadd.f32 %v1124_v57, %v672_v63 }
 0x217   : > { %v677_v4 = vsel %vm676_vm6, %v1124_v57, %v673_v1 }
 0x218   : > { %v682_v5 = vsel %vm679_vm7, %v681_v2, %v677_v4 }
 0x219   : > { %v683_v6 = vmul.f32 %v682_v5, %v658_v3 }
 0x21b   : > { %v1031_v7 = vclamps-f32 %v683_v6, 1.0 }
 0x21d   : > { %v686_v9 = vadd.f32 1.0, %v1031_v7 }
 0x21f   : > { %v687_v10 = vmul.f32 %v686_v9, %v644_v8 }
 0x221   : > { %v689_v11 = vsel %vm688_vm8, %v687_v10, 0.0  ;;  %v692_v12 = vmul.f32 %v687_v10, %v687_v10 }
 0x222   : > { %690 = vadd.xlane.f32.xlu2 %v689_v11 }
 0x223   : > { %v693_v13 = vsel %vm688_vm8, %v692_v12, 0.0 }
 0x22a   : > { %694 = vadd.xlane.f32.xlu2 %v693_v13 }
 0x295   : > { %v691_v14 = vpop.xlane.xlu2 %690 }
 0x296   : > { %v696_v19 = vmul.f32 0.03125, %v691_v14 }
 0x298   : > { %v698_v21 = vmul.f32 %v696_v19, %v696_v19  ;;  %v701_v32 = vsub.f32 %v687_v10, %v696_v19 }
 0x29d   : > { %v695_v20 = vpop.xlane.xlu2 %694 }
 0x29e   : > { %v697_v22 = vmul.f32 0.03125, %v695_v20  ;;  %v842_v20 = vld [vmem:[#allocation2 + $0x38] sm:$0xff] }
 0x29f   : > { %858 = vmatpush.msra.mxu2 %v842_v20 }
 0x2a0   : > { %v699_v23 = vsub.f32 %v697_v22, %v698_v21  ;;  %v841_v21 = vld [vmem:[#allocation2 + $0x30] sm:$0xff]  ;;  %v840_v22 = vld [vmem:[#allocation2 + $0x28] sm:$0xff] }
 0x2a1   : > { %859 = vmatpush.msra.mxu2 %v841_v21 }
 0x2a2   : > { %v700_v24 = vmax.f32 %v699_v23, 0.0  ;;  %v839_v23 = vld [vmem:[#allocation2 + $0x20] sm:$0xff] }
 0x2a3   : > { %860 = vmatpush.msra.mxu2 %v840_v22 }
 0x2a4   : > { %v702_v25 = vadd.f32 1e-05, %v700_v24  ;;  %v838_v24 = vld [vmem:[#allocation2 + $0x18] sm:$0xff] }
 0x2a5   : > { %861 = vmatpush.msra.mxu2 %v839_v23 }
 0x2a6   : > { %1125 = vrsqrt.f32 %v702_v25  ;;  %vm709_vm10 = vweird.f32 %v702_v25 }
 0x2a7   : > { %862 = vmatpush.msra.mxu2 %v838_v24 }
 0x2ac   : > { %v1126_v26 = vpop.eup %1125 }
 0x2ad   : > { %v704_v27 = vmul.f32 %v1126_v26, %v702_v25  ;;  %vm710_vm9 = vweird.f32 %v1126_v26  ;;  %v837_v25 = vld [vmem:[#allocation2 + $0x10] sm:$0xff] }
 0x2ae   : > { %vm711_vm11 = vmor %vm709_vm10, %vm710_vm9  ;;  %863 = vmatpush.msra.mxu2 %v837_v25 }
 0x2af   : > { %v705_v28 = vmul.f32 %v1126_v26, %v704_v27 }
 0x2b1   : > { %v706_v29 = vmul.f32 0.5, %v705_v28  ;;  %v835_v28 = vld [vmem:[#allocation2] sm:$0xff] }
 0x2b3   : > { %v707_v30 = vsub.f32 1.5, %v706_v29 }
 0x2b5   : > { %v708_v31 = vmul.f32 %v1126_v26, %v707_v30 }
 0x2b7   : > { %v712_v34 = vsel %vm711_vm11, %v1126_v26, %v708_v31  ;;  %v836_v26 = vld [vmem:[#allocation2 + $0x8] sm:$0xff] }
 0x2b8   : > { %v713_v35 = vmul.f32 %v712_v34, %v701_v32  ;;  %864 = vmatpush.msra.mxu2 %v836_v26 }
 0x2ba   : > { %v718_v37 = vmul.f32 %v1115_v33, %v713_v35  ;;  %865 = vmatpush.msra.mxu2 %v835_v28 }
 0x2bc   : > { %v723_v38 = vadd.f32 %v1116_v36, %v718_v37 }
 0x2be   : > { %1032 = vmatmul.msk.f32.vlgmr.msra.gmra.mxu1 %vm688_vm8, %v723_v38 }
 0x33b   : > { %v752_v40 = vpop.f32.mrf.mxu1 }
 0x33c   : > { %v753_v41 = vadd.f32 %v1117_v39, %v752_v40 }
 0x33e   : > { %v756_v42 = vmul.f32 0.70710677, %v753_v41  ;;  %v755_v14 = vmul.f32 0.5, %v753_v41 }
 0x340   : > { %v757_v43 = vmul.f32 %v756_v42, %v756_v42 }
 0x342   : > { %v758_v44 = vmin.f32 %v757_v43, 16.0  ;;  %v1118_v43 = vld [vmem:[%s1501_s11] ss:$0 sm:$0xff] }
 0x344   : > { %v759_v45 = vmul.f32 2.1237322e-06, %v758_v44  ;;  %v770_v46 = vmul.f32 3.8918573e-05, %v758_v44 }
 0x346   : > { %v760_v47 = vadd.f32 0.00028619796, %v759_v45  ;;  %v771_v48 = vadd.f32 0.001143296, %v770_v46  ;;  %v1119_v46 = vld [vmem:[%s1502_s12] ss:$0 sm:$0xff] }
 0x348   : > { %v761_v49 = vmul.f32 %v760_v47, %v758_v44  ;;  %v772_v50 = vmul.f32 %v771_v48, %v758_v44 }
 0x34a   : > { %v773_v51 = vadd.f32 0.014752088, %v772_v50  ;;  %v762_v52 = vadd.f32 0.0036580483, %v761_v49  ;;  %v1120_v49 = vld [vmem:[%s1504_s14] ss:$0 sm:$0xff] }
 0x34c   : > { %v774_v53 = vmul.f32 %v773_v51, %v758_v44  ;;  %v763_v55 = vmul.f32 %v762_v52, %v758_v44 }
 0x34e   : > { %v775_v54 = vadd.f32 0.112945676, %v774_v53  ;;  %v764_v58 = vadd.f32 0.05243302, %v763_v55 }
 0x350   : > { %v776_v56 = vmul.f32 %v775_v54, %v758_v44  ;;  %v765_v61 = vmul.f32 %v764_v58, %v758_v44 }
 0x352   : > { %v777_v57 = vadd.f32 0.4994258, %v776_v56  ;;  %v766_v62 = vadd.f32 0.18741608, %v765_v61 }
 0x354   : > { %v778_v59 = vmul.f32 %v777_v57, %v758_v44  ;;  %v767_v0 = vmul.f32 %v766_v62, %v758_v44 }
 0x356   : > { %v779_v60 = vadd.f32 1.0, %v778_v59  ;;  %v768_v4 = vadd.f32 1.1283791, %v767_v0 }
 0x358   : > { %1127 = vrcp.f32 %v779_v60  ;;  %v791_v3 = vand.u32 2147483648, %v779_v60  ;;  %v789_v6 = vand.u32 2147483647, %v779_v60  ;;  %vm785_vm13 = vweird.f32 %v779_v60 }
 0x359   : > { %v769_v9 = vmul.f32 %v768_v4, %v756_v42 }
 0x35a   : > { %v792_v8 = vor.u32 1.1754944e-38, %v791_v3  ;;  %vm790_vm15 = vcmp.eq.f32.partialorder %v789_v6, 8.507059e+37 }
 0x35e   : > { %v1128_v63 = vpop.eup %1127 }
 0x35f   : > { %v781_v1 = vmul.f32 %v1128_v63, %v779_v60  ;;  %vm786_vm12 = vweird.f32 %v1128_v63 }
 0x360   : > { %vm787_vm14 = vmor %vm785_vm13, %vm786_vm12 }
 0x361   : > { %v782_v2 = vsub.f32 1.0, %v781_v1 }
 0x363   : > { %v783_v5 = vmul.f32 %v1128_v63, %v782_v2 }
 0x365   : > { %v784_v7 = vadd.f32 %v1128_v63, %v783_v5 }
 0x367   : > { %v788_v10 = vsel %vm787_vm14, %v1128_v63, %v784_v7 }
 0x368   : > { %v793_v11 = vsel %vm790_vm15, %v792_v8, %v788_v10 }
 0x369   : > { %v794_v12 = vmul.f32 %v793_v11, %v769_v9 }
 0x36b   : > { %v1033_v13 = vclamps-f32 %v794_v12, 1.0 }
 0x36d   : > { %v797_v15 = vadd.f32 1.0, %v1033_v13 }
 0x36f   : > { %v798_v16 = vmul.f32 %v797_v15, %v755_v14 }
 0x371   : > { %v800_v17 = vsel %vm799_vm0, %v798_v16, 0.0  ;;  %v803_v18 = vmul.f32 %v798_v16, %v798_v16 }
 0x372   : > { %801 = vadd.xlane.f32.xlu0 %v800_v17 }
 0x373   : > { %v804_v19 = vsel %vm799_vm0, %v803_v18, 0.0 }
 0x374   : > { %805 = vadd.xlane.f32.xlu1 %v804_v19 }
 0x3e5   : > { %v802_v27 = vpop.xlane.xlu0 %801 }
 0x3e6   : > { %v807_v29 = vmul.f32 0.015625, %v802_v27 }
 0x3e7   : > { %v806_v30 = vpop.xlane.xlu1 %805 }
 0x3e8   : > { %v809_v31 = vmul.f32 %v807_v29, %v807_v29  ;;  %v808_v32 = vmul.f32 0.015625, %v806_v30  ;;  %v812_v42 = vsub.f32 %v798_v16, %v807_v29 }
 0x3ea   : > { %v810_v33 = vsub.f32 %v808_v32, %v809_v31 }
 0x3ec   : > { %v811_v34 = vmax.f32 %v810_v33, 0.0 }
 0x3ee   : > { %v813_v35 = vadd.f32 1e-05, %v811_v34 }
 0x3f0   : > { %1129 = vrsqrt.f32 %v813_v35  ;;  %vm820_vm2 = vweird.f32 %v813_v35 }
 0x3f6   : > { %v1130_v36 = vpop.eup %1129 }
 0x3f7   : > { %v815_v37 = vmul.f32 %v1130_v36, %v813_v35  ;;  %vm821_vm1 = vweird.f32 %v1130_v36 }
 0x3f8   : > { %vm822_vm3 = vmor %vm820_vm2, %vm821_vm1 }
 0x3f9   : > { %v816_v38 = vmul.f32 %v1130_v36, %v815_v37 }
 0x3fb   : > { %v817_v39 = vmul.f32 0.5, %v816_v38 }
 0x3fd   : > { %v818_v40 = vsub.f32 1.5, %v817_v39 }
 0x3ff   : > { %v819_v41 = vmul.f32 %v1130_v36, %v818_v40 }
 0x401   : > { %v823_v44 = vsel %vm822_vm3, %v1130_v36, %v819_v41 }
 0x402   : > { %v824_v45 = vmul.f32 %v823_v44, %v812_v42 }
 0x404   : > { %v829_v47 = vmul.f32 %v1118_v43, %v824_v45 }
 0x406   : > { %v834_v48 = vadd.f32 %v1119_v46, %v829_v47 }
 0x408   : > { %1034 = vmatmul.msk.f32.vlgmr.msra.gmra.mxu2 %vm799_vm0, %v834_v48 }
 0x48b   : > { %v867_v50 = vpop.f32.mrf.mxu2 }
 0x48c   : > { %v868_v51 = vadd.f32 %v1120_v49, %v867_v50 }
 0x48e   : > { %v871_v52 = vmul.f32 0.70710677, %v868_v51  ;;  %v870_v24 = vmul.f32 0.5, %v868_v51 }
 0x490   : > { %v872_v53 = vmul.f32 %v871_v52, %v871_v52 }
 0x492   : > { %v873_v54 = vmin.f32 %v872_v53, 16.0 }
 0x494   : > { %v874_v55 = vmul.f32 2.1237322e-06, %v873_v54  ;;  %v885_v56 = vmul.f32 3.8918573e-05, %v873_v54 }
 0x496   : > { %v875_v57 = vadd.f32 0.00028619796, %v874_v55  ;;  %v886_v58 = vadd.f32 0.001143296, %v885_v56 }
 0x498   : > { %v876_v59 = vmul.f32 %v875_v57, %v873_v54  ;;  %v887_v60 = vmul.f32 %v886_v58, %v873_v54 }
 0x49a   : > { %v888_v61 = vadd.f32 0.014752088, %v887_v60  ;;  %v877_v62 = vadd.f32 0.0036580483, %v876_v59 }
 0x49c   : > { %v889_v63 = vmul.f32 %v888_v61, %v873_v54  ;;  %v878_v1 = vmul.f32 %v877_v62, %v873_v54 }
 0x49e   : > { %v890_v0 = vadd.f32 0.112945676, %v889_v63  ;;  %v879_v4 = vadd.f32 0.05243302, %v878_v1 }
 0x4a0   : > { %v891_v2 = vmul.f32 %v890_v0, %v873_v54  ;;  %v880_v7 = vmul.f32 %v879_v4, %v873_v54 }
 0x4a2   : > { %v892_v3 = vadd.f32 0.4994258, %v891_v2  ;;  %v881_v8 = vadd.f32 0.18741608, %v880_v7 }
 0x4a4   : > { %v893_v5 = vmul.f32 %v892_v3, %v873_v54  ;;  %v882_v10 = vmul.f32 %v881_v8, %v873_v54 }
 0x4a6   : > { %v894_v6 = vadd.f32 1.0, %v893_v5  ;;  %v883_v14 = vadd.f32 1.1283791, %v882_v10 }
 0x4a8   : > { %1131 = vrcp.f32 %v894_v6  ;;  %v906_v13 = vand.u32 2147483648, %v894_v6  ;;  %v904_v16 = vand.u32 2147483647, %v894_v6  ;;  %vm900_vm5 = vweird.f32 %v894_v6 }
 0x4a9   : > { %v884_v19 = vmul.f32 %v883_v14, %v871_v52 }
 0x4aa   : > { %v907_v18 = vor.u32 1.1754944e-38, %v906_v13  ;;  %vm905_vm7 = vcmp.eq.f32.partialorder %v904_v16, 8.507059e+37 }
 0x4ae   : > { %v1132_v9 = vpop.eup %1131 }
 0x4af   : > { %v896_v11 = vmul.f32 %v1132_v9, %v894_v6  ;;  %vm901_vm4 = vweird.f32 %v1132_v9 }
 0x4b0   : > { %vm902_vm6 = vmor %vm900_vm5, %vm901_vm4 }
 0x4b1   : > { %v897_v12 = vsub.f32 1.0, %v896_v11 }
 0x4b3   : > { %v898_v15 = vmul.f32 %v1132_v9, %v897_v12 }
 0x4b5   : > { %v899_v17 = vadd.f32 %v1132_v9, %v898_v15 }
 0x4b7   : > { %v903_v20 = vsel %vm902_vm6, %v1132_v9, %v899_v17 }
 0x4b8   : > { %v908_v21 = vsel %vm905_vm7, %v907_v18, %v903_v20 }
 0x4b9   : > { %v909_v22 = vmul.f32 %v908_v21, %v884_v19 }
 0x4bb   : > { %v1035_v23 = vclamps-f32 %v909_v22, 1.0 }
 0x4bd   : > { %v912_v25 = vadd.f32 1.0, %v1035_v23 }
 0x4bf   : > { %v913_v26 = vmul.f32 %v912_v25, %v870_v24 }
 0x4c1   : > { %914 = vst [vmem:[%s526_s27] sm:$0xff] %v913_v26 }
 0x4c2   : > { %1190 = shalt.err (!%p1187_p9)
}
 0x4c3   : > { %1045 = dma.vmem_to_hbm [thread:$0]  (%p1370_p4), %s931_s18, 128, %s933_s17, %s916_s21  }
 0x4c4 PF: > { %s1527_s28 = sld [smem:[#allocation8_spill]]  ;;  %p1057_p10 = scmp.ge.s32.totalorder %s1245_s23, 2 }
 0x4c6   : > { %p1052_p11 = pnand %p1057_p10, %p1377_p8 }
 0x4c8   : > { %p1053_p12 = pneg %p1052_p11 }
 0x4ca   : > { %s944_s27 = sand.u32 1, %s1527_s28  }
 0x4cb   : > { %s945_s26 = scalar_lea.sflag [#allocation4], %s944_s27 }
 0x4cc   : > { %1220 = dma.done.wait (%p1053_p12), %s945_s26, 128  }
 0x4cd   : > { %1222 = vsyncadd (%p1053_p12), %s945_s26, 4294967168  ;;  %s29_s23 = sadd.s32 1, %s1245_s23   ;;  %s1528_s21 = sld [smem:[#allocation9_spill]] }
 0x4ce   : > { %p26_p13 = scmp.ge.s32.totalorder %s29_s23, 4   ;;  %s1529_s22 = sld [smem:[#allocation10_spill]] }
 0x4cf   : > { %s1530_s18 = smov %s1229_s19  ;;  %s1531_s19 = smov %s1233_s20 }
 0x4d0   : > { %s1532_s20 = smov %s1383_s16  ;;  %28 = sbr.rel (!%p26_p13) target bundleno = 10 (0xa), region = 120 }
 0x4d5   :  { %951 = vsyncpa [#allocation3], 1 }
 0x4d6   :  { %953 = vsyncpa [#allocation3 + $0x1], 1 }
 0x4d7   :  { %954 = vsyncpa [#allocation4], 1 }
 0x4d8   :  { %956 = vsyncpa [#allocation4 + $0x1], 1 }

</bundles_post_ra>
